<compile_context>
chip_gen: v7x
topology: tpu7x:2x2x1
jax: 0.10.0
libtpu: 0.0.40
codegen_flags: <defaults>
</compile_context>

<pallas_src>
import math

import jax
import jax.numpy as jnp
from jax.experimental import pallas as pl
from jax.experimental.pallas import tpu as pltpu

# ---- problem sizes taken from the reference module -------------------------
N_ACTIONS = -62 - (-82) + 1                     # 21
N_STA = 4
N_AP = 4
N_TOTAL = N_AP * (N_STA + 1)                    # 20
N_OBSERVATIONS = (N_STA + 1) * (N_TOTAL + 1)    # 105
HIDDEN = 128

ACT_PAD = 128            # lane-dense output -> unmasked vst
MAX_BATCH_TILE = 2048    # ~3 MiB/step double-buffered: fits default scoped VMEM everywhere


def _round_up(v, m):
    return ((v + m - 1) // m) * m


# ---------------------------------------------------------------------------
# Kernel: one batch tile, all three matmuls + ReLUs fused (MXU + VPU).
# ---------------------------------------------------------------------------
def _dqn_kernel(x_ref, w1_ref, b1_ref, w2_ref, b2_ref, w3_ref, b3_ref, o_ref):
    # x arrives in f32 straight from HBM; cast to the MXU dtype on the VPU.
    x = x_ref[...].astype(w1_ref.dtype)
    # layer 1: matmul with f32 accumulation, bias + ReLU on the f32 accumulator
    h1 = jnp.dot(x, w1_ref[...], preferred_element_type=jnp.float32) + b1_ref[...]
    h1 = jnp.maximum(h1, 0.0).astype(w2_ref.dtype)
    # layer 2
    h2 = jnp.dot(h1, w2_ref[...], preferred_element_type=jnp.float32) + b2_ref[...]
    h2 = jnp.maximum(h2, 0.0).astype(w3_ref.dtype)
    # layer 3 (no activation)
    o_ref[...] = (
        jnp.dot(h2, w3_ref[...], preferred_element_type=jnp.float32) + b3_ref[...]
    ).astype(o_ref.dtype)


# ---------------------------------------------------------------------------
# One-time parameter preparation (padding + dtype cast) -- do NOT call per step.
# ---------------------------------------------------------------------------
def prepare_params(params, compute_dtype=jnp.bfloat16):
    """Pad/cast weights once. Biases stay f32 (added on the f32 accumulator)."""
    w1, b1, w2, b2, w3, b3 = params
    w1_p = w1.astype(compute_dtype)                                  # (105, 128)
    b1_p = b1.reshape(1, HIDDEN).astype(jnp.float32)
    w2_p = w2.astype(compute_dtype)                                  # (128, 128)
    b2_p = b2.reshape(1, HIDDEN).astype(jnp.float32)
    w3_p = jnp.pad(w3, ((0, 0), (0, ACT_PAD - N_ACTIONS))).astype(compute_dtype)
    b3_p = jnp.pad(b3, (0, ACT_PAD - N_ACTIONS)).reshape(1, ACT_PAD).astype(jnp.float32)
    return (w1_p, b1_p, w2_p, b2_p, w3_p, b3_p)


# ---------------------------------------------------------------------------
# Forward pass wrapper: x goes in as-is (f32, unpadded); batch is grid-tiled.
# ---------------------------------------------------------------------------
def dqn_forward(x, packed_params):
    """x: (B, N_OBSERVATIONS) float32. Returns (B, N_ACTIONS) float32."""
    w1_p, b1_p, w2_p, b2_p, w3_p, b3_p = packed_params
    compute_dtype = w1_p.dtype
    out_dtype = compute_dtype  # bf16 on the fast path halves the output HBM stream
    B = x.shape[0]

    # Balanced batch tiling:
    #   * at least 2 tiles for non-trivial B so both v7x TensorCores are used,
    #   * tiles rounded to 16 rows (bf16-native sublane packing),
    #   * partial last block handled by Pallas masked writeback (no batch pad).
    if B >= 32:
        n_tiles = max(2, pl.cdiv(B, MAX_BATCH_TILE))
    else:
        n_tiles = 1
    bt = _round_up(pl.cdiv(B, n_tiles), 16)
    grid = (pl.cdiv(B, bt),)

    w_itemsize = jnp.dtype(compute_dtype).itemsize
    o_itemsize = jnp.dtype(out_dtype).itemsize
    flops = 2 * B * (N_OBSERVATIONS * HIDDEN + HIDDEN * HIDDEN + HIDDEN * ACT_PAD)
    bytes_accessed = (
        x.size * 4
        + (w1_p.size + w2_p.size + w3_p.size) * w_itemsize
        + (b1_p.size + b2_p.size + b3_p.size) * 4
        + B * ACT_PAD * o_itemsize
    )

    # Weights/biases use constant index_maps so they stay VMEM-resident across
    # all batch tiles; only x / o move per grid step.
    out_p = pl.pallas_call(
        _dqn_kernel,
        out_shape=jax.ShapeDtypeStruct((B, ACT_PAD), out_dtype),
        grid=grid,
        in_specs=[
            pl.BlockSpec((bt, N_OBSERVATIONS), lambda i: (i, 0)),
            pl.BlockSpec((N_OBSERVATIONS, HIDDEN), lambda i: (0, 0)),
            pl.BlockSpec((1, HIDDEN), lambda i: (0, 0)),
            pl.BlockSpec((HIDDEN, HIDDEN), lambda i: (0, 0)),
            pl.BlockSpec((1, HIDDEN), lambda i: (0, 0)),
            pl.BlockSpec((HIDDEN, ACT_PAD), lambda i: (0, 0)),
            pl.BlockSpec((1, ACT_PAD), lambda i: (0, 0)),
        ],
        out_specs=pl.BlockSpec((bt, ACT_PAD), lambda i: (i, 0)),
        compiler_params=pltpu.CompilerParams(
            dimension_semantics=("parallel",),
        ),
        cost_estimate=pl.CostEstimate(
            flops=flops, transcendentals=0, bytes_accessed=bytes_accessed
        ),
    )(x, w1_p, b1_p, w2_p, b2_p, w3_p, b3_p)

    # Drop padded action columns; return f32 to match the reference semantics.
    return out_p[:, :N_ACTIONS].astype(jnp.float32)


# ---------------------------------------------------------------------------
# Init + pure-JAX reference (matches PyTorch nn.Linear semantics).
# ---------------------------------------------------------------------------
def init_params(key):
    """Deterministic init mirroring nn.Linear's U(-1/sqrt(fan_in), 1/sqrt(fan_in))."""
    ks = jax.random.split(key, 6)

    def linear(kw, kb, fan_in, fan_out):
        bound = 1.0 / math.sqrt(fan_in)
        w = jax.random.uniform(kw, (fan_in, fan_out), jnp.float32, -bound, bound)
        b = jax.random.uniform(kb, (fan_out,), jnp.float32, -bound, bound)
        return w, b

    w1, b1 = linear(ks[0], ks[1], N_OBSERVATIONS, HIDDEN)
    w2, b2 = linear(ks[2], ks[3], HIDDEN, HIDDEN)
    w3, b3 = linear(ks[4], ks[5], HIDDEN, N_ACTIONS)
    return (w1, b1, w2, b2, w3, b3)


def dqn_reference(x, params):
    w1, b1, w2, b2, w3, b3 = params
    h1 = jnp.maximum(x @ w1 + b1, 0.0)
    h2 = jnp.maximum(h1 @ w2 + b2, 0.0)
    return h2 @ w3 + b3


if __name__ == "__main__":
    key = jax.random.PRNGKey(0)
    k_params, k_x = jax.random.split(key)
    params = init_params(k_params)

    batch = 2
    x = jax.random.normal(k_x, (batch, N_OBSERVATIONS), jnp.float32)
    ref = dqn_reference(x, params)

    fwd = jax.jit(dqn_forward)

    # 1) exact-precision path (f32 weights/activations/output) -- tight tolerance
    params_f32 = prepare_params(params, compute_dtype=jnp.float32)
    out_f32 = fwd(x, params_f32)
    jax.block_until_ready(out_f32)
    assert out_f32.shape == (batch, N_ACTIONS), out_f32.shape
    assert jnp.allclose(out_f32, ref, atol=1e-4, rtol=1e-4), float(
        jnp.max(jnp.abs(out_f32 - ref))
    )

    # 2) fast path (bf16 matmul inputs + bf16 output, f32 accumulation)
    params_bf16 = prepare_params(params, compute_dtype=jnp.bfloat16)
    out_bf16 = fwd(x, params_bf16)
    jax.block_until_ready(out_bf16)
    assert out_bf16.shape == (batch, N_ACTIONS), out_bf16.shape
    assert jnp.allclose(out_bf16, ref, atol=3e-2, rtol=3e-2), float(
        jnp.max(jnp.abs(out_bf16 - ref))
    )

    # 3) larger batch: exercises the multi-tile grid (>=2 parallel tiles) and
    #    the masked partial last block (no silent truncation, no batch pad op)
    big_batch = 300
    xb = jax.random.normal(jax.random.PRNGKey(1), (big_batch, N_OBSERVATIONS), jnp.float32)
    out_big = fwd(xb, params_bf16)
    jax.block_until_ready(out_big)
    ref_big = dqn_reference(xb, params)
    assert out_big.shape == (big_batch, N_ACTIONS), out_big.shape
    assert jnp.allclose(out_big, ref_big, atol=3e-2, rtol=3e-2), float(
        jnp.max(jnp.abs(out_big - ref_big))
    )

    print("KERNEL_OK")
</pallas_src>

<mosaic_0001>
module attributes {stable_mosaic.version = 11 : i64} {
  func.func @_dqn_kernel(%arg0: i32, %arg1: memref<16x105xf32, #tpu.memory_space<vmem>>, %arg2: memref<105x128xf32, #tpu.memory_space<vmem>>, %arg3: memref<1x128xf32, #tpu.memory_space<vmem>>, %arg4: memref<128x128xf32, #tpu.memory_space<vmem>>, %arg5: memref<1x128xf32, #tpu.memory_space<vmem>>, %arg6: memref<128x128xf32, #tpu.memory_space<vmem>>, %arg7: memref<1x128xf32, #tpu.memory_space<vmem>>, %arg8: memref<16x128xf32, #tpu.memory_space<vmem>>) attributes {dimension_semantics = [#tpu.dimension_semantics<parallel>], iteration_bounds = array<i64: 1>, scalar_prefetch = 0 : i64, scratch_operands = 0 : i64, tpu.core_type = #tpu.core_type<tc>, window_params = [{transform_indices = @transform_0, window_bounds = array<i64: 16, 105>}, {pipeline_mode = #tpu.pipeline_mode<synchronous>, transform_indices = @transform_1, window_bounds = array<i64: 105, 128>}, {pipeline_mode = #tpu.pipeline_mode<synchronous>, transform_indices = @transform_2, window_bounds = array<i64: 1, 128>}, {pipeline_mode = #tpu.pipeline_mode<synchronous>, transform_indices = @transform_3, window_bounds = array<i64: 128, 128>}, {pipeline_mode = #tpu.pipeline_mode<synchronous>, transform_indices = @transform_4, window_bounds = array<i64: 1, 128>}, {pipeline_mode = #tpu.pipeline_mode<synchronous>, transform_indices = @transform_5, window_bounds = array<i64: 128, 128>}, {pipeline_mode = #tpu.pipeline_mode<synchronous>, transform_indices = @transform_6, window_bounds = array<i64: 1, 128>}, {transform_indices = @transform_7, window_bounds = array<i64: 16, 128>}]} {
    %c0 = arith.constant 0 : index
    %c0_0 = arith.constant 0 : index
    %0 = vector.load %arg1[%c0, %c0_0] : memref<16x105xf32, #tpu.memory_space<vmem>>, vector<16x105xf32>
    %c0_1 = arith.constant 0 : index
    %c0_2 = arith.constant 0 : index
    %1 = vector.load %arg2[%c0_1, %c0_2] : memref<105x128xf32, #tpu.memory_space<vmem>>, vector<105x128xf32>
    %cst = arith.constant dense<0.000000e+00> : vector<16x128xf32>
    %2 = tpu.matmul %0, %1, %cst {dimension_numbers = #tpu.dot_dimension_numbers<[1], [0], [0], [1], [0, 0, 1, 1], [], []>} : vector<16x105xf32>, vector<105x128xf32>, vector<16x128xf32> -> vector<16x128xf32>
    %c0_3 = arith.constant 0 : index
    %c0_4 = arith.constant 0 : index
    %3 = vector.load %arg3[%c0_3, %c0_4] : memref<1x128xf32, #tpu.memory_space<vmem>>, vector<1x128xf32>
    %4 = vector.broadcast %3 : vector<1x128xf32> to vector<16x128xf32>
    %5 = arith.addf %2, %4 : vector<16x128xf32>
    %cst_5 = arith.constant 0.000000e+00 : f32
    %6 = vector.broadcast %cst_5 : f32 to vector<16x128xf32>
    %7 = arith.maximumf %5, %6 : vector<16x128xf32>
    %c0_6 = arith.constant 0 : index
    %c0_7 = arith.constant 0 : index
    %8 = vector.load %arg4[%c0_6, %c0_7] : memref<128x128xf32, #tpu.memory_space<vmem>>, vector<128x128xf32>
    %cst_8 = arith.constant dense<0.000000e+00> : vector<16x128xf32>
    %9 = tpu.matmul %7, %8, %cst_8 {dimension_numbers = #tpu.dot_dimension_numbers<[1], [0], [0], [1], [0, 0, 1, 1], [], []>} : vector<16x128xf32>, vector<128x128xf32>, vector<16x128xf32> -> vector<16x128xf32>
    %c0_9 = arith.constant 0 : index
    %c0_10 = arith.constant 0 : index
    %10 = vector.load %arg5[%c0_9, %c0_10] : memref<1x128xf32, #tpu.memory_space<vmem>>, vector<1x128xf32>
    %11 = vector.broadcast %10 : vector<1x128xf32> to vector<16x128xf32>
    %12 = arith.addf %9, %11 : vector<16x128xf32>
    %cst_11 = arith.constant 0.000000e+00 : f32
    %13 = vector.broadcast %cst_11 : f32 to vector<16x128xf32>
    %14 = arith.maximumf %12, %13 : vector<16x128xf32>
    %c0_12 = arith.constant 0 : index
    %c0_13 = arith.constant 0 : index
    %15 = vector.load %arg6[%c0_12, %c0_13] : memref<128x128xf32, #tpu.memory_space<vmem>>, vector<128x128xf32>
    %cst_14 = arith.constant dense<0.000000e+00> : vector<16x128xf32>
    %16 = tpu.matmul %14, %15, %cst_14 {dimension_numbers = #tpu.dot_dimension_numbers<[1], [0], [0], [1], [0, 0, 1, 1], [], []>} : vector<16x128xf32>, vector<128x128xf32>, vector<16x128xf32> -> vector<16x128xf32>
    %c0_15 = arith.constant 0 : index
    %c0_16 = arith.constant 0 : index
    %17 = vector.load %arg7[%c0_15, %c0_16] : memref<1x128xf32, #tpu.memory_space<vmem>>, vector<1x128xf32>
    %18 = vector.broadcast %17 : vector<1x128xf32> to vector<16x128xf32>
    %19 = arith.addf %16, %18 : vector<16x128xf32>
    %c0_17 = arith.constant 0 : index
    %c0_18 = arith.constant 0 : index
    %20 = vector.load %arg8[%c0_17, %c0_18] : memref<16x128xf32, #tpu.memory_space<vmem>>, vector<16x128xf32>
    tpu.vector_store %arg8[%c0_17, %c0_18], %19 {strides = array<i32>} : memref<16x128xf32, #tpu.memory_space<vmem>>, vector<16x128xf32>,
    return
  }
  func.func @transform_0(%arg0: i32) -> (i32, i32) {
    %c0_i32 = arith.constant 0 : i32
    %c0_i32_0 = arith.constant 0 : i32
    return %arg0, %c0_i32 : i32, i32
  }
  func.func @transform_1(%arg0: i32) -> (i32, i32) {
    %c0_i32 = arith.constant 0 : i32
    %c0_i32_0 = arith.constant 0 : i32
    %c0_i32_1 = arith.constant 0 : i32
    return %c0_i32, %c0_i32_0 : i32, i32
  }
  func.func @transform_2(%arg0: i32) -> (i32, i32) {
    %c0_i32 = arith.constant 0 : i32
    %c0_i32_0 = arith.constant 0 : i32
    %c0_i32_1 = arith.constant 0 : i32
    return %c0_i32, %c0_i32_0 : i32, i32
  }
  func.func @transform_3(%arg0: i32) -> (i32, i32) {
    %c0_i32 = arith.constant 0 : i32
    %c0_i32_0 = arith.constant 0 : i32
    %c0_i32_1 = arith.constant 0 : i32
    return %c0_i32, %c0_i32_0 : i32, i32
  }
  func.func @transform_4(%arg0: i32) -> (i32, i32) {
    %c0_i32 = arith.constant 0 : i32
    %c0_i32_0 = arith.constant 0 : i32
    %c0_i32_1 = arith.constant 0 : i32
    return %c0_i32, %c0_i32_0 : i32, i32
  }
  func.func @transform_5(%arg0: i32) -> (i32, i32) {
    %c0_i32 = arith.constant 0 : i32
    %c0_i32_0 = arith.constant 0 : i32
    %c0_i32_1 = arith.constant 0 : i32
    return %c0_i32, %c0_i32_0 : i32, i32
  }
  func.func @transform_6(%arg0: i32) -> (i32, i32) {
    %c0_i32 = arith.constant 0 : i32
    %c0_i32_0 = arith.constant 0 : i32
    %c0_i32_1 = arith.constant 0 : i32
    return %c0_i32, %c0_i32_0 : i32, i32
  }
  func.func @transform_7(%arg0: i32) -> (i32, i32) {
    %c0_i32 = arith.constant 0 : i32
    %c0_i32_0 = arith.constant 0 : i32
    return %arg0, %c0_i32 : i32, i32
  }
}

</mosaic_0001>

<bundles_post_ra>
// kernel: dqn_forward.1
= control target key start
LH: loop header
LB: loop body
LE: loop exit
PB: predicated region body
PF: predicated region fallthrough
CT: control target
= control target key end

     0   :  { %12 = vsyncpa [#allocation3], 0  ;;  %s936_s0 = inlined_call_operand.hbm [shape: f32[2,105], index: 0, kind: input, shape index: {}]   ;;  %s937_s1 = inlined_call_operand.hbm [shape: f32[105,128], index: 1, kind: input, shape index: {}]   ;;  %s938_s2 = inlined_call_operand.vmem [shape: f32[1,128], index: 2, kind: input, shape index: {}]   ;;  %s939_s3 = inlined_call_operand.hbm [shape: f32[128,128], index: 3, kind: input, shape index: {}]   ;;  %s940_s4 = inlined_call_operand.vmem [shape: f32[1,128], index: 4, kind: input, shape index: {}]   ;;  %s941_s5 = inlined_call_operand.hbm [shape: f32[128,128], index: 5, kind: input, shape index: {}]   ;;  %s942_s6 = inlined_call_operand.vmem [shape: f32[1,128], index: 6, kind: input, shape index: {}]   ;;  %s943_s7 = inlined_call_operand.hbm [shape: f32[2,128], index: 7, kind: output, shape index: {}]  }
   0x1   :  { %13 = vsyncpa [#allocation6], 0 }
   0x2   :  { %14 = vsyncpa [#allocation9], 0 }
   0x3   :  { %15 = vsyncpa [#allocation4], 0 }
   0x4   :  { %20 = vsyncadd [#allocation3], 224  ;;  %s793_s24 = smov [#allocation5]   ;;  %s675_s28 = scalar_lea.hbm %s937_s1, 1792 }
   0x5   :  { %s33_s25 = sshll.u32 %s793_s24, 4  ;;  %p676_p0 = scmp.ne.s32.totalorder %s937_s1, %s675_s28  ;;  %s34_s25 = int_to_ptr.vmem [resolvable:$true] %s33_s25 }
   0x6   :  { %p679_p1 = scmp.lt.u32.totalorder %s675_s28, %s937_s1 }
   0x8   :  { %p681_p2 = pnand %p679_p1, %p676_p0 }
   0xa   :  { %684 = shalt.err (!%p681_p2)
}
   0xb   :  { %s685_s10 = scalar_lea.vmem %s34_s25, 1792  ;;  %p690_p4 = scmp.lt.s32.totalorder %s34_s25, %s34_s25 }
   0xc   :  { %p686_p3 = scmp.ne.s32.totalorder %s34_s25, %s685_s10  ;;  %p691_p5 = scmp.lt.s32.totalorder %s685_s10, %s685_s10 }
   0xe   :  { %p692_p6 = por %p691_p5, %p690_p4 }
  0x10   :  { %p693_p7 = pnand %p692_p6, %p686_p3 }
  0x12   :  { %696 = shalt.err (!%p693_p7)
}
  0x13   :  { %s794_s11 = smov 128   ;;  %s795_s12 = smov 8  }
  0x14   :  { %39 = dma.hbm_to_vmem [thread:$0]  %s937_s1, 1792, %s34_s25, [#allocation6], %s794_s11, %s794_s11, %s795_s12  }
  0x15   :  { %s796_s15 = smov [#allocation2]   ;;  %s697_s19 = scalar_lea.hbm %s936_s0, 32 }
  0x16   :  { %s21_s16 = sshll.u32 %s796_s15, 4  ;;  %p698_p8 = scmp.ne.s32.totalorder %s936_s0, %s697_s19  ;;  %s22_s16 = int_to_ptr.vmem [resolvable:$true] %s21_s16 }
  0x17   :  { %p701_p9 = scmp.lt.u32.totalorder %s697_s19, %s936_s0 }
  0x19   :  { %p703_p10 = pnand %p701_p9, %p698_p8 }
  0x1b   :  { %706 = shalt.err (!%p703_p10)
}
  0x1c   :  { %s707_s24 = scalar_lea.vmem %s22_s16, 32  ;;  %s711_s1 = scalar_lea.vmem %s22_s16, 256 }
  0x1d   :  { %p708_p11 = scmp.ne.s32.totalorder %s22_s16, %s707_s24  ;;  %p712_p12 = scmp.lt.s32.totalorder %s22_s16, %s22_s16 }
  0x1e   :  { %p713_p13 = scmp.lt.s32.totalorder %s711_s1, %s707_s24 }
  0x20   :  { %p714_p0 = por %p713_p13, %p712_p12 }
  0x22   :  { %p715_p1 = pnand %p714_p0, %p708_p11 }
  0x24   :  { %718 = shalt.err (!%p715_p1)
}
  0x25   :  { %s797_s25 = smov 32   ;;  %s798_s26 = smov 2  }
  0x26   :  { %27 = dma.hbm_to_vmem [thread:$0]  %s936_s0, 32, %s22_s16, [#allocation3], %s797_s25, %s797_s25, %s798_s26  }
  0x27   :  { %s799_s29 = smov [#allocation7]   ;;  %s800_s8 = smov [#allocation8]  }
  0x28   :  { %s47_s30 = sshll.u32 %s799_s29, 4  ;;  %s61_s9 = sshll.u32 %s800_s8, 4  ;;  %s48_s30 = int_to_ptr.vmem [resolvable:$true] %s47_s30  ;;  %s873_s9 = int_to_ptr.vmem [resolvable:$true] %s61_s9 }
  0x29   :  { %s719_s14 = scalar_lea.hbm %s939_s3, 2048 }
  0x2a   :  { %p720_p2 = scmp.ne.s32.totalorder %s939_s3, %s719_s14  ;;  %p723_p3 = scmp.lt.u32.totalorder %s719_s14, %s939_s3 }
  0x2c   :  { %p725_p4 = pnand %p723_p3, %p720_p2 }
  0x2e   :  { %728 = shalt.err (!%p725_p4)
}
  0x2f   :  { %s729_s0 = scalar_lea.vmem %s48_s30, 2048  ;;  %p734_p6 = scmp.lt.s32.totalorder %s48_s30, %s48_s30 }
  0x30   :  { %p730_p5 = scmp.ne.s32.totalorder %s48_s30, %s729_s0  ;;  %p735_p7 = scmp.lt.s32.totalorder %s729_s0, %s729_s0 }
  0x32   :  { %p736_p8 = por %p735_p7, %p734_p6 }
  0x34   :  { %p737_p9 = pnand %p736_p8, %p730_p5 }
  0x36   :  { %740 = shalt.err (!%p737_p9)
}
  0x37   :  { %53 = dma.hbm_to_vmem [thread:$0]  %s939_s3, 2048, %s48_s30, [#allocation6], %s794_s11, %s794_s11, %s795_s12  }
  0x38   :  { %s741_s23 = scalar_lea.hbm %s941_s5, 2048 }
  0x39   :  { %p742_p10 = scmp.ne.s32.totalorder %s941_s5, %s741_s23  ;;  %p745_p11 = scmp.lt.u32.totalorder %s741_s23, %s941_s5 }
  0x3b   :  { %p747_p12 = pnand %p745_p11, %p742_p10 }
  0x3d   :  { %750 = shalt.err (!%p747_p12)
}
  0x3e   :  { %s751_s29 = scalar_lea.vmem %s873_s9, 2048  ;;  %p756_p0 = scmp.lt.s32.totalorder %s873_s9, %s873_s9 }
  0x3f   :  { %p752_p13 = scmp.ne.s32.totalorder %s873_s9, %s751_s29  ;;  %p757_p1 = scmp.lt.s32.totalorder %s751_s29, %s751_s29 }
  0x41   :  { %p758_p2 = por %p757_p1, %p756_p0 }
  0x43   :  { %p759_p3 = pnand %p758_p2, %p752_p13 }
  0x45   :  { %762 = shalt.err (!%p759_p3)
}
  0x46   :  { %67 = dma.hbm_to_vmem [thread:$0]  %s941_s5, 2048, %s873_s9, [#allocation9], %s794_s11, %s794_s11, %s795_s12  }
  0x47   :  { %785 = dma.done.wait [#allocation3], 256  }
  0x48   :  { %786 = vsyncadd [#allocation3], 4294967040 }
  0x49   :  { %787 = dma.done.wait [#allocation6], 3840  }
  0x4a   :  { %788 = vsyncadd [#allocation6], 4294963456 }
  0x4b   :  { %789 = dma.done.wait [#allocation9], 2048  }
  0x4c   :  { %790 = vsyncadd [#allocation9], 4294965248  ;;  %v84_v0 = vld [vmem:[#allocation5] sm:$0xff]  ;;  %v85_v1 = vld [vmem:[#allocation5 + $0x8] sm:$0xff]  ;;  %vm105_vm0 = vcmask 859136   ;;  %vm112_vm1 = vcmask 1040384  }
  0x4d   :  { %v86_v2 = vld [vmem:[#allocation5 + $0x10] sm:$0xff]  ;;  %v571_v3 = vpack.c.bf16 %v85_v1, %v84_v0  ;;  %v87_v4 = vld [vmem:[#allocation5 + $0x18] sm:$0xff]  ;;  %v88_v6 = vld [vmem:[#allocation5 + $0x20] sm:$0xff]  ;;  %vm801_vm2 = vmmov 1  }
  0x4e   :  { %v575_v5 = vpack.c.bf16 %v87_v4, %v86_v2  ;;  %v89_v7 = vld [vmem:[#allocation5 + $0x28] sm:$0xff]  ;;  %v82_v8 = vld [vmem:[#allocation2] sm:$0xff]  ;;  %v194_v12 = vld [vmem:[#allocation7 + $0x8] sm:$0xff] }
  0x4f   :  { %572 = vmatprep.subr.bf16.mxu0 %v571_v3  ;;  %v579_v9 = vpack.c.bf16 %v89_v7, %v88_v6  ;;  %v90_v10 = vld [vmem:[#allocation5 + $0x30] sm:$0xff]  ;;  %498 = vmatprep.mubr.msk.f32.mxu0 %vm105_vm0, %v82_v8  ;;  %v91_v13 = vld [vmem:[#allocation5 + $0x38] sm:$0xff]  ;;  %v195_v15 = vld [vmem:[#allocation7 + $0x10] sm:$0xff] }
  0x50   :  { %574 = vmatpush3.bf16.msra.mxu0 %v571_v3  ;;  %v193_v11 = vld [vmem:[#allocation7] sm:$0xff]  ;;  %v196_v16 = vld [vmem:[#allocation7 + $0x18] sm:$0xff]  ;;  %v198_v19 = vld [vmem:[#allocation7 + $0x28] sm:$0xff]  ;;  %v583_v20 = vpack.c.bf16 %v91_v13, %v90_v10 }
  0x51   :  { %576 = vmatprep.subr.bf16.mxu0 %v575_v5  ;;  %v601_v14 = vpack.c.bf16 %v194_v12, %v193_v11  ;;  %v605_v17 = vpack.c.bf16 %v196_v16, %v195_v15  ;;  %v197_v18 = vld [vmem:[#allocation7 + $0x20] sm:$0xff]  ;;  %v92_v21 = vld [vmem:[#allocation5 + $0x40] sm:$0xff]  ;;  %v93_v22 = vld [vmem:[#allocation5 + $0x48] sm:$0xff] }
  0x52   :  { %v609_v23 = vpack.c.bf16 %v198_v19, %v197_v18  ;;  %v199_v24 = vld [vmem:[#allocation7 + $0x30] sm:$0xff]  ;;  %v200_v25 = vld [vmem:[#allocation7 + $0x38] sm:$0xff]  ;;  %v587_v26 = vpack.c.bf16 %v93_v22, %v92_v21  ;;  %v94_v27 = vld [vmem:[#allocation5 + $0x50] sm:$0xff] }
  0x53   :  { %602 = vmatprep.subr.bf16.mxu1 %v601_v14  ;;  %v95_v28 = vld [vmem:[#allocation5 + $0x58] sm:$0xff]  ;;  %v613_v29 = vpack.c.bf16 %v200_v25, %v199_v24  ;;  %v201_v30 = vld [vmem:[#allocation7 + $0x40] sm:$0xff]  ;;  %v96_v33 = vld [vmem:[#allocation5 + $0x60] sm:$0xff] }
  0x54   :  { %578 = vmatpush3.bf16.msra.mxu0 %v575_v5  ;;  %604 = vmatpush3.bf16.msra.mxu1 %v601_v14  ;;  %v202_v31 = vld [vmem:[#allocation7 + $0x48] sm:$0xff]  ;;  %v591_v32 = vpack.c.bf16 %v95_v28, %v94_v27  ;;  %v97_v34 = vld [vmem:[#allocation5 + $0x68] sm:$0x1]  ;;  %v203_v36 = vld [vmem:[#allocation7 + $0x50] sm:$0xff] }
  0x55   :  { %580 = vmatprep.subr.bf16.mxu0 %v579_v9  ;;  %606 = vmatprep.subr.bf16.mxu1 %v605_v17  ;;  %v617_v35 = vpack.c.bf16 %v202_v31, %v201_v30  ;;  %v204_v37 = vld [vmem:[#allocation7 + $0x58] sm:$0xff]  ;;  %v595_v38 = vpack.c.bf16 %v97_v34, %v96_v33  ;;  %vm596_vm3 = vmpackc.low %vm112_vm1, %vm801_vm2  ;;  %v205_v40 = vld [vmem:[#allocation7 + $0x60] sm:$0xff] }
  0x56   :  { %v621_v39 = vpack.c.bf16 %v204_v37, %v203_v36  ;;  %v206_v41 = vld [vmem:[#allocation7 + $0x68] sm:$0xff]  ;;  %v207_v44 = vld [vmem:[#allocation7 + $0x70] sm:$0xff]  ;;  %v208_v45 = vld [vmem:[#allocation7 + $0x78] sm:$0xff] }
  0x57   :  { %v625_v42 = vpack.c.bf16 %v206_v41, %v205_v40  ;;  %v83_v43 = vld [vmem:[#allocation2 + $0x8] sm:$0xff]  ;;  %v629_v46 = vpack.c.bf16 %v208_v45, %v207_v44  ;;  %v293_v47 = vld [vmem:[#allocation8] sm:$0xff]  ;;  %v295_v49 = vld [vmem:[#allocation8 + $0x10] sm:$0xff] }
  0x58   :  { %582 = vmatpush3.bf16.msra.mxu0 %v579_v9  ;;  %608 = vmatpush3.bf16.msra.mxu1 %v605_v17  ;;  %v294_v48 = vld [vmem:[#allocation8 + $0x8] sm:$0xff]  ;;  %v296_v51 = vld [vmem:[#allocation8 + $0x18] sm:$0xff]  ;;  %v297_v53 = vld [vmem:[#allocation8 + $0x20] sm:$0xff] }
  0x59   :  { %584 = vmatprep.subr.bf16.mxu0 %v583_v20  ;;  %610 = vmatprep.subr.bf16.mxu1 %v609_v23  ;;  %v633_v50 = vpack.c.bf16 %v294_v48, %v293_v47  ;;  %v637_v52 = vpack.c.bf16 %v296_v51, %v295_v49  ;;  %v298_v54 = vld [vmem:[#allocation8 + $0x28] sm:$0xff]  ;;  %v299_v56 = vld [vmem:[#allocation8 + $0x30] sm:$0xff]  ;;  %v300_v57 = vld [vmem:[#allocation8 + $0x38] sm:$0xff] }
  0x5a   :  { %v641_v55 = vpack.c.bf16 %v298_v54, %v297_v53  ;;  %v645_v58 = vpack.c.bf16 %v300_v57, %v299_v56  ;;  %v301_v59 = vld [vmem:[#allocation8 + $0x40] sm:$0xff]  ;;  %v302_v60 = vld [vmem:[#allocation8 + $0x48] sm:$0xff]  ;;  %v303_v62 = vld [vmem:[#allocation8 + $0x50] sm:$0xff] }
  0x5b   :  { %v649_v61 = vpack.c.bf16 %v302_v60, %v301_v59  ;;  %v304_v63 = vld [vmem:[#allocation8 + $0x58] sm:$0xff]  ;;  %v305_v1 = vld [vmem:[#allocation8 + $0x60] sm:$0xff]  ;;  %v306_v2 = vld [vmem:[#allocation8 + $0x68] sm:$0xff] }
  0x5c   :  { %586 = vmatpush3.bf16.msra.mxu0 %v583_v20  ;;  %612 = vmatpush3.bf16.msra.mxu1 %v609_v23  ;;  %v653_v0 = vpack.c.bf16 %v304_v63, %v303_v62  ;;  %v657_v3 = vpack.c.bf16 %v306_v2, %v305_v1  ;;  %v412_v4 = vld [vmem:[%s938_s2] ss:$0 sm:$0xff]  ;;  %v307_v11 = vld [vmem:[#allocation8 + $0x70] sm:$0xff]  ;;  %v308_v12 = vld [vmem:[#allocation8 + $0x78] sm:$0xff] }
  0x5d   :  { %588 = vmatprep.subr.bf16.mxu0 %v587_v26  ;;  %614 = vmatprep.subr.bf16.mxu1 %v613_v29  ;;  %v661_v13 = vpack.c.bf16 %v308_v12, %v307_v11  ;;  %v416_v14 = vld [vmem:[%s940_s4] ss:$0 sm:$0xff] }
  0x5e   :  { %v417_v21 = vld [vmem:[%s942_s6] ss:$0 sm:$0xff] }
  0x60   :  { %590 = vmatpush3.bf16.msra.mxu0 %v587_v26  ;;  %616 = vmatpush3.bf16.msra.mxu1 %v613_v29 }
  0x61   :  { %592 = vmatprep.subr.bf16.mxu0 %v591_v32  ;;  %618 = vmatprep.subr.bf16.mxu1 %v617_v35 }
  0x64   :  { %594 = vmatpush3.bf16.msra.mxu0 %v591_v32  ;;  %620 = vmatpush3.bf16.msra.mxu1 %v617_v35 }
  0x65   :  { %597 = vmatprep.subr.msk.bf16.mxu0 %vm596_vm3, %v595_v38  ;;  %622 = vmatprep.subr.bf16.mxu1 %v621_v39 }
  0x68   :  { %600 = vmatpush3.bf16.msk.msra.mxu0 %vm596_vm3, %v595_v38  ;;  %624 = vmatpush3.bf16.msra.mxu1 %v621_v39 }
  0x69   :  { %626 = vmatprep.subr.bf16.mxu1 %v625_v42  ;;  %634 = vmatprep.subr.bf16.mxu0 %v633_v50 }
  0x6b   :  { %499 = vmatmul.mubr.msk.f32.vlgmr.msra.gmra.mrb[0].mxu0 %vm105_vm0, %v83_v43 }
  0x6c   :  { %628 = vmatpush3.bf16.msra.mxu1 %v625_v42  ;;  %636 = vmatpush3.bf16.msra.mxu0 %v633_v50 }
  0x6d   :  { %630 = vmatprep.subr.bf16.mxu1 %v629_v46  ;;  %638 = vmatprep.subr.bf16.mxu0 %v637_v52 }
  0x70   :  { %632 = vmatpush3.bf16.msra.mxu1 %v629_v46  ;;  %640 = vmatpush3.bf16.msra.mxu0 %v637_v52 }
  0x71   :  { %642 = vmatprep.subr.bf16.mxu0 %v641_v55 }
  0x74   :  { %644 = vmatpush3.bf16.msra.mxu0 %v641_v55 }
  0x75   :  { %646 = vmatprep.subr.bf16.mxu0 %v645_v58 }
  0x78   :  { %648 = vmatpush3.bf16.msra.mxu0 %v645_v58 }
  0x79   :  { %650 = vmatprep.subr.bf16.mxu0 %v649_v61 }
  0x7c   :  { %652 = vmatpush3.bf16.msra.mxu0 %v649_v61 }
  0x7d   :  { %654 = vmatprep.subr.bf16.mxu0 %v653_v0 }
  0x80   :  { %656 = vmatpush3.bf16.msra.mxu0 %v653_v0 }
  0x81   :  { %658 = vmatprep.subr.bf16.mxu0 %v657_v3 }
  0x84   :  { %660 = vmatpush3.bf16.msra.mxu0 %v657_v3 }
  0x85   :  { %662 = vmatprep.subr.bf16.mxu0 %v661_v13 }
  0x88   :  { %664 = vmatpush3.bf16.msra.mxu0 %v661_v13 }
 0x13e   :  { %v500_v5 = vpop.f32.mrb[0].mxu0 }
 0x13f   :  { %v188_v6 = vadd.f32 %v500_v5, %v412_v4  ;;  %v182_v7 = vpop.f32.mrb[1].mxu0 }
 0x140   :  { %v183_v8 = vadd.f32 %v412_v4, %v182_v7 }
 0x141   :  { %v192_v10 = vmax.f32 %v188_v6, 0.0 }
 0x142   :  { %v191_v9 = vmax.f32 %v183_v8, 0.0 }
 0x144   :  { %533 = vmatprep.mubr.f32.mxu1 %v191_v9 }
 0x145   :  { %534 = vmatmul.mubr.f32.vlgmr.msra.gmra.mrb[0].mxu1 %v192_v10 }
 0x218   :  { %v535_v15 = vpop.f32.mrb[0].mxu1 }
 0x219   :  { %v288_v16 = vadd.f32 %v535_v15, %v416_v14  ;;  %v282_v17 = vpop.f32.mrb[1].mxu1 }
 0x21a   :  { %v283_v18 = vadd.f32 %v416_v14, %v282_v17 }
 0x21b   :  { %v292_v20 = vmax.f32 %v288_v16, 0.0 }
 0x21c   :  { %v291_v19 = vmax.f32 %v283_v18, 0.0 }
 0x21e   :  { %568 = vmatprep.mubr.f32.mxu0 %v291_v19 }
 0x21f   :  { %569 = vmatmul.mubr.f32.vlgmr.msra.gmra.mrb[2].mxu0 %v292_v20 }
 0x2f2   :  { %v570_v22 = vpop.f32.mrb[2].mxu0 }
 0x2f3   :  { %v388_v23 = vadd.f32 %v570_v22, %v417_v21  ;;  %v382_v24 = vpop.f32.mrb[3].mxu0 }
 0x2f4   :  { %v383_v25 = vadd.f32 %v417_v21, %v382_v24 }
 0x2f5   :  { %392 = vst [vmem:[#allocation10 + $0x8] sm:$0xff] %v388_v23 }
 0x2f6   :  { %391 = vst [vmem:[#allocation10] sm:$0xff] %v383_v25 }
 0x2f7   :  { %397 = vsyncadd [#allocation4], 224  ;;  %s802_s4 = smov [#allocation10]  }
 0x2f8   :  { %s398_s10 = sshll.u32 %s802_s4, 4  ;;  %s399_s10 = int_to_ptr.vmem [resolvable:$true] %s398_s10 }
 0x2f9   :  { %s763_s13 = scalar_lea.vmem %s399_s10, 32  ;;  %s767_s14 = scalar_lea.vmem %s399_s10, 256 }
 0x2fa   :  { %p764_p4 = scmp.ne.s32.totalorder %s399_s10, %s763_s13  ;;  %p768_p5 = scmp.lt.s32.totalorder %s399_s10, %s399_s10 }
 0x2fb   :  { %p769_p6 = scmp.lt.s32.totalorder %s767_s14, %s763_s13 }
 0x2fd   :  { %p770_p7 = por %p769_p6, %p768_p5 }
 0x2ff   :  { %p771_p8 = pnand %p770_p7, %p764_p4 }
 0x301   :  { %774 = shalt.err (!%p771_p8)
}
 0x302   :  { %s775_s17 = scalar_lea.hbm %s943_s7, 32 }
 0x303   :  { %p776_p9 = scmp.ne.s32.totalorder %s943_s7, %s775_s17  ;;  %p779_p10 = scmp.lt.u32.totalorder %s775_s17, %s943_s7 }
 0x305   :  { %p781_p11 = pnand %p779_p10, %p776_p9 }
 0x307   :  { %784 = shalt.err (!%p781_p11)
}
 0x308   :  { %404 = dma.vmem_to_hbm [thread:$0]  %s399_s10, 32, %s943_s7, [#allocation4], %s797_s25, %s797_s25, %s798_s26  }
 0x309   :  { %791 = dma.done.wait [#allocation4], 256  }
 0x30a   :  { %792 = vsyncadd [#allocation4], 4294967040 }
 0x30b   :  { %408 = vsyncpa [#allocation3], 1 }
 0x30c   :  { %409 = vsyncpa [#allocation6], 1 }
 0x30d   :  { %410 = vsyncpa [#allocation9], 1 }
 0x30e   :  { %411 = vsyncpa [#allocation4], 1 }

</bundles_post_ra>
